<compile_context>
chip_gen: v6e
topology: v6e:2x2x1
jax: 0.10.0
libtpu: 0.0.40
codegen_flags: <defaults>
</compile_context>

<pallas_src>
import functools

import numpy as np
import jax
import jax.numpy as jnp
from jax import lax
from jax.experimental import pallas as pl
from jax.experimental.pallas import tpu as pltpu


def _round_up(x: int, m: int) -> int:
    return ((x + m - 1) // m) * m


# ----------------------------------------------------------------------------
# Pallas kernel 1: row-wise L2 normalization with eps clamp
#   y = x / max(||x||_2, eps)  ==  x * rsqrt(max(||x||^2, eps^2))
# ----------------------------------------------------------------------------
def _l2_norm_kernel(x_ref, o_ref, *, eps):
    x = x_ref[...].astype(jnp.float32)
    ss = jnp.sum(x * x, axis=-1, keepdims=True)
    inv = lax.rsqrt(jnp.maximum(ss, eps * eps))   # single EUP op, no divide on the VALU
    o_ref[...] = (x * inv).astype(o_ref.dtype)


def l2_normalize(x: jax.Array, eps: float) -> jax.Array:
    orig_shape = x.shape
    D = orig_shape[-1]
    x2 = x.reshape(-1, D)
    R = x2.shape[0]
    if R == 0:
        return x
    itemsize = jnp.dtype(x.dtype).itemsize

    # Byte-targeted row tile: ~2 MiB per block. in+out, double-buffered, is ~8 MiB of
    # VMEM -> safe on v7x (64 MiB) and near the HBM roofline on all three generations.
    target_bytes = 2 * 1024 * 1024
    rows = max(8, ((target_bytes // max(D * itemsize, 1)) // 8) * 8)
    R8 = _round_up(R, 8)              # pad rows only to a sublane multiple (no TR-sized waste)
    TR = min(rows, R8)
    if R8 >= 16 and pl.cdiv(R8, TR) < 2:
        TR = _round_up(pl.cdiv(R8, 2), 8)   # >=2 grid steps so both v7x TCs get work
    if R8 != R:
        x2 = jnp.pad(x2, ((0, R8 - R), (0, 0)))

    # NOTE: if D is not a multiple of 128 (demo D=32) the output stores are masked
    # vst.msk; per review we accept that rather than shrinking the block further.
    out = pl.pallas_call(
        functools.partial(_l2_norm_kernel, eps=float(eps)),
        out_shape=jax.ShapeDtypeStruct((R8, D), x.dtype),
        grid_spec=pltpu.PrefetchScalarGridSpec(
            num_scalar_prefetch=0,
            grid=(pl.cdiv(R8, TR),),
            in_specs=[pl.BlockSpec((TR, D), lambda i: (i, 0))],
            out_specs=pl.BlockSpec((TR, D), lambda i: (i, 0)),
        ),
        compiler_params=pltpu.CompilerParams(
            dimension_semantics=("parallel",),
        ),
        cost_estimate=pl.CostEstimate(
            flops=3 * R8 * D,
            transcendentals=R8,
            bytes_accessed=2 * R8 * D * itemsize,
        ),
    )(x2)
    if R8 != R:
        out = out[:R]
    return out.reshape(orig_shape)


# ----------------------------------------------------------------------------
# Pallas kernel 2: exact data-dependent row gather (replaces the one-hot matmul).
#   out[i, :] = table[offsets[i], :]
# Offsets are scalar-prefetched into SMEM; the table stays in HBM; each grid step
# issues `rows_per_step` overlapped HBM->VMEM row DMAs directly into its output block.
# ----------------------------------------------------------------------------
def _dma_gather_kernel(off_ref, emb_hbm, out_ref, sems, *, rows_per_step):
    base = pl.program_id(0) * rows_per_step
    # Issue all row copies for this tile (overlapping DMAs) ...
    for g in range(rows_per_step):
        row = off_ref[base + g]
        pltpu.make_async_copy(
            emb_hbm.at[pl.ds(row, 1), :],
            out_ref.at[pl.ds(g, 1), :],
            sems.at[g],
        ).start()
    # ... then drain them before the output block is written back.
    for g in range(rows_per_step):
        pltpu.make_async_copy(
            emb_hbm.at[pl.ds(0, 1), :],
            out_ref.at[pl.ds(g, 1), :],
            sems.at[g],
        ).wait()


def gather_rows(cached_embeddings: jax.Array, offsets: jax.Array,
                *, rows_per_step: int = 16) -> jax.Array:
    X, D = cached_embeddings.shape
    M = int(offsets.shape[0])
    itemsize = jnp.dtype(cached_embeddings.dtype).itemsize

    # G rows per grid step amortizes the ~0.35us/step overhead; keep >=2 grid steps
    # when possible so v7x's two TensorCores both participate.
    G = max(8, _round_up(rows_per_step, 8))
    M8 = _round_up(M, 8)
    G = min(G, M8)
    if M8 >= 16 and pl.cdiv(M8, G) < 2:
        G = _round_up(pl.cdiv(M8, 2), 8)
    Mp = _round_up(M, G)
    off_p = jnp.pad(offsets.astype(jnp.int32), (0, Mp - M))   # pad with row 0 (always valid)

    out = pl.pallas_call(
        functools.partial(_dma_gather_kernel, rows_per_step=G),
        out_shape=jax.ShapeDtypeStruct((Mp, D), cached_embeddings.dtype),
        grid_spec=pltpu.PrefetchScalarGridSpec(
            num_scalar_prefetch=1,                          # offsets -> SMEM
            grid=(Mp // G,),
            in_specs=[pl.BlockSpec(memory_space=pl.ANY)],   # table stays in HBM, no auto-DMA
            out_specs=pl.BlockSpec((G, D), lambda i, off: (i, 0)),
            scratch_shapes=[pltpu.SemaphoreType.DMA((G,))],
        ),
        compiler_params=pltpu.CompilerParams(
            dimension_semantics=("parallel",),
        ),
        cost_estimate=pl.CostEstimate(
            flops=0,
            transcendentals=0,
            bytes_accessed=2 * Mp * D * itemsize + Mp * 4,
        ),
    )(off_p, cached_embeddings)
    return out[:M]


# ----------------------------------------------------------------------------
# JAX port of InBatchNegativesSampler
# ----------------------------------------------------------------------------
class InBatchNegativesSampler:
    def __init__(self, l2_norm: bool, l2_norm_eps: float,
                 dedup_embeddings: bool) -> None:
        self._l2_norm = l2_norm
        self._l2_norm_eps = l2_norm_eps
        self._dedup_embeddings = dedup_embeddings
        self._cached_ids = None
        self._cached_embeddings = None

    def debug_str(self) -> str:
        s = f"in-batch{(f'-l2-eps{self._l2_norm_eps}' if self._l2_norm else '')}"
        if self._dedup_embeddings:
            s += "-dedup"
        return s

    def _maybe_l2_norm(self, x: jax.Array) -> jax.Array:
        if self._l2_norm:
            x = l2_normalize(x, self._l2_norm_eps)
        return x

    def normalize_embeddings(self, x: jax.Array) -> jax.Array:
        return self._maybe_l2_norm(x)

    def process_batch(self, ids, presences, embeddings) -> None:
        # TODO(synk): presence masking / torch.unique dedup produce dynamic shapes with
        # no static-shape Pallas equivalent; they stay host-side (one host round-trip).
        D = embeddings.shape[-1]
        ids_np = np.asarray(ids).reshape(-1)
        pres_np = np.asarray(presences).reshape(-1).astype(bool)
        emb_np = np.asarray(embeddings).reshape(-1, D)
        valid_ids = ids_np[pres_np]
        valid_emb = emb_np[pres_np]
        if self._dedup_embeddings:
            unique_ids, inverse = np.unique(valid_ids, return_inverse=True)
            offsets = np.zeros((unique_ids.size,), dtype=np.int64)
            # last-write-wins, matching the torch scatter semantics
            offsets[inverse] = np.arange(valid_ids.size, dtype=np.int64)
            cached_emb = valid_emb[offsets, :]
            cached_ids = unique_ids
        else:
            cached_emb = valid_emb
            cached_ids = valid_ids
        # Cache the normalized f32 table ONCE; forward() never re-casts / re-pads it.
        cached_emb = jnp.asarray(cached_emb, dtype=jnp.float32)
        self._cached_embeddings = self._maybe_l2_norm(cached_emb)
        self._cached_ids = jnp.asarray(cached_ids, dtype=jnp.int32)

    def get_all_ids_and_embeddings(self):
        return self._cached_ids, self._cached_embeddings

    def forward(self, positive_ids: jax.Array, num_to_sample: int, *, key):
        X = int(self._cached_ids.shape[0])
        if X == 0:
            raise ValueError("InBatchNegativesSampler: empty cache (X == 0); "
                             "cannot sample negatives.")
        D = self._cached_embeddings.shape[-1]
        offsets_shape = tuple(positive_ids.shape) + (num_to_sample,)
        # torch.randint(low=0, high=X) equivalent (RNG glue, outside the kernel).
        sampled_offsets = jax.random.randint(
            key, offsets_shape, 0, X, dtype=jnp.int32)
        flat_offsets = sampled_offsets.reshape(-1)
        # id gather is trivial XLA work; keep it out of the kernel.
        sampled_ids = jnp.take(self._cached_ids, flat_offsets).reshape(
            offsets_shape).astype(positive_ids.dtype)
        emb_flat = gather_rows(self._cached_embeddings, flat_offsets)
        sampled_negative_embeddings = emb_flat.reshape(offsets_shape + (D,))
        return sampled_ids, sampled_negative_embeddings


if __name__ == "__main__":
    key = jax.random.PRNGKey(0)
    k1, k2, k3, k4 = jax.random.split(key, 4)

    B, N, D = 2, 8, 32
    num_to_sample = 4

    ids = jax.random.randint(k1, (B, N), 0, 20, dtype=jnp.int32)
    presences = jax.random.bernoulli(k2, 0.8, (B, N))
    presences = presences.at[0, 0].set(True)   # guarantee a non-empty cache
    embeddings = jax.random.normal(k3, (B, N, D), dtype=jnp.float32)

    sampler = InBatchNegativesSampler(
        l2_norm=True, l2_norm_eps=1e-6, dedup_embeddings=True)
    sampler.process_batch(ids, presences, embeddings)

    positive_ids = ids  # (B, N)
    sampled_ids, sampled_neg_emb = sampler.forward(
        positive_ids, num_to_sample, key=k4)
    jax.block_until_ready((sampled_ids, sampled_neg_emb))

    assert sampled_ids.shape == (B, N, num_to_sample)
    assert sampled_neg_emb.shape == (B, N, num_to_sample, D)

    # Reference check: recompute the same offsets (same key / shape / bounds) and
    # gather with plain jnp.take; the Pallas DMA gather is exact.
    cached_ids, cached_emb = sampler.get_all_ids_and_embeddings()
    X = cached_ids.shape[0]
    ref_off = jax.random.randint(
        k4, (B, N, num_to_sample), 0, X, dtype=jnp.int32).reshape(-1)
    ref_ids = jnp.take(cached_ids, ref_off).reshape(B, N, num_to_sample)
    ref_emb = jnp.take(cached_emb, ref_off, axis=0).reshape(
        B, N, num_to_sample, D)
    assert bool(jnp.all(ref_ids.astype(sampled_ids.dtype) == sampled_ids))
    assert bool(jnp.max(jnp.abs(ref_emb - sampled_neg_emb)) < 1e-6)

    # Sanity: every sampled embedding row must be (close to) unit norm.
    norms = jnp.linalg.norm(sampled_neg_emb, axis=-1)
    assert bool(jnp.all(jnp.abs(norms - 1.0) < 1e-4))

    # Also exercise normalize_embeddings on a fresh tensor (l2 kernel, ragged rows).
    extra = jax.random.normal(jax.random.PRNGKey(7), (B, N, D), dtype=jnp.float32)
    extra_n = sampler.normalize_embeddings(extra)
    jax.block_until_ready(extra_n)
    ref_n = extra / jnp.clip(jnp.linalg.norm(extra, axis=-1, keepdims=True), 1e-6, None)
    assert bool(jnp.max(jnp.abs(extra_n - ref_n)) < 1e-5)

    print("KERNEL_OK")
</pallas_src>

<mosaic_0001>
module attributes {stable_mosaic.version = 11 : i64} {
  func.func @_l2_norm_kernel(%arg0: i32, %arg1: memref<8x32xf32, #tpu.memory_space<vmem>>, %arg2: memref<8x32xf32, #tpu.memory_space<vmem>>) attributes {dimension_semantics = [#tpu.dimension_semantics<parallel>], iteration_bounds = array<i64: 2>, scalar_prefetch = 0 : i64, scratch_operands = 0 : i64, tpu.core_type = #tpu.core_type<tc>, window_params = [{transform_indices = @transform_0, window_bounds = array<i64: 8, 32>}, {transform_indices = @transform_1, window_bounds = array<i64: 8, 32>}]} {
    %c0 = arith.constant 0 : index
    %c0_0 = arith.constant 0 : index
    %0 = vector.load %arg1[%c0, %c0_0] : memref<8x32xf32, #tpu.memory_space<vmem>>, vector<8x32xf32>
    %1 = arith.mulf %0, %0 : vector<8x32xf32>
    %cst = arith.constant dense<0.000000e+00> : vector<8xf32>
    %2 = vector.multi_reduction <add>, %1, %cst [1] : vector<8x32xf32> to vector<8xf32>
    %3 = vector.shape_cast %2 : vector<8xf32> to vector<8x1xf32>
    %cst_1 = arith.constant 9.99999996E-13 : f32
    %4 = vector.broadcast %cst_1 : f32 to vector<8x1xf32>
    %5 = arith.maximumf %3, %4 : vector<8x1xf32>
    %6 = math.rsqrt %5 : vector<8x1xf32>
    %7 = vector.broadcast %6 : vector<8x1xf32> to vector<8x32xf32>
    %8 = arith.mulf %0, %7 : vector<8x32xf32>
    %c0_2 = arith.constant 0 : index
    %c0_3 = arith.constant 0 : index
    %9 = vector.load %arg2[%c0_2, %c0_3] : memref<8x32xf32, #tpu.memory_space<vmem>>, vector<8x32xf32>
    tpu.vector_store %arg2[%c0_2, %c0_3], %8 {strides = array<i32>} : memref<8x32xf32, #tpu.memory_space<vmem>>, vector<8x32xf32>,
    return
  }
  func.func @transform_0(%arg0: i32) -> (i32, i32) {
    %c0_i32 = arith.constant 0 : i32
    %c0_i32_0 = arith.constant 0 : i32
    return %arg0, %c0_i32 : i32, i32
  }
  func.func @transform_1(%arg0: i32) -> (i32, i32) {
    %c0_i32 = arith.constant 0 : i32
    %c0_i32_0 = arith.constant 0 : i32
    return %arg0, %c0_i32 : i32, i32
  }
}

</mosaic_0001>

<bundles_post_ra>
// kernel: tpu_custom_call.1
= control target key start
LH: loop header
LB: loop body
LE: loop exit
PB: predicated region body
PF: predicated region fallthrough
CT: control target
= control target key end

     0   :  { %6 = vsyncpa [#allocation3], 0  ;;  %s533_s0 = inlined_call_operand.hbm [shape: f32[16,32], index: 0, kind: input, shape index: {}]   ;;  %s534_s1 = inlined_call_operand.hbm [shape: f32[16,32], index: 1, kind: output, shape index: {}]  }
   0x1   :  { %8 = vsyncpa [#allocation3 + $0x1], 0 }
   0x2   :  { %9 = vsyncpa [#allocation4], 0 }
   0x3   :  { %11 = vsyncpa [#allocation4 + $0x1], 0  ;;  %s392_s6 = smov 0   ;;  %s394_s7 = smov 0  }
   0x4   :  { %s396_s8 = smov 0   ;;  %s398_s9 = smov 0  }
   0x5 LB: > { %s413_s10 = sadd.s32 4294967295, %s378_s9   ;;  %s226_s11 = sadd.s32 4294967294, %s378_s9   ;;  %s378_s9 = sphi %s398_s9, %s551_s9   ;;  %s374_s8 = sphi %s396_s8, %s550_s8   ;;  %s370_s7 = sphi %s394_s7, %s549_s7   ;;  %s366_s6 = sphi %s392_s6, %s548_s6  }
   0x6   : > { %s417_s12 = sadd.s32 1, %s378_s9   ;;  %s24_s13 = sadd.s32 1, %s374_s8 }
   0x7   : > { %s21_s14 = ssub.s32 %s378_s9, %s417_s12  ;;  %p31_p0 = scmp.ne.s32.totalorder %s374_s8, %s370_s7 }
   0x8   : > { %p22_p1 = scmp.eq.s32.totalorder %s21_s14, 0  ;;  %p32_p2 = scmp.eq.s32.totalorder %s378_s9, 0 }
   0x9   : > { %p37_p3 = scmp.ne.s32.totalorder %s370_s7, %s366_s6  ;;  %p38_p4 = scmp.eq.s32.totalorder %s413_s10, 0 }
   0xa   : > { %s429_s15 = scalar_select %p22_p1, %s374_s8, %s24_s13  }
   0xb   : > { %p431_p5 = por %p32_p2, %p31_p0  ;;  %p435_p6 = por %p38_p4, %p37_p3 }
   0xc   : > { %p61_p7 = scmp.eq.s32.totalorder %s413_s10, 1  ;;  %p67_p8 = scmp.eq.s32.totalorder %s226_s11, 1 }
   0xd   : > { %s538_s17 = scalar_select %p435_p6, 1, 0 }
   0xe   : > { %p250_p10 = scmp.lt.s32.totalorder %s378_s9, 2  ;;  %p442_p11 = por %p61_p7, %p31_p0 }
   0xf   : > { %p446_p12 = por %p67_p8, %p37_p3  ;;  %s87_s20 = sand.u32 1, %s374_s8  }
  0x10   : > { %s539_s18 = scalar_select %p442_p11, 1, 0 }
  0x11   : > { %s540_s19 = scalar_select %p446_p12, 1, 0 }
  0x12   : > { %s230_s21 = sshll.u32 %s378_s9, 7  ;;  %s229_s22 = sshll.u32 %s87_s20, 3 }
  0x13   : > { %s455_s25 = scalar_lea.hbm %s533_s0, %s230_s21  ;;  %s91_s26 = scalar_lea.vmem [#allocation2], %s229_s22 }
  0x14   : > { %s98_s27 = sshll.u32 %s91_s26, 4  ;;  %p459_p13 = pnand %p250_p10, %p431_p5  ;;  %s463_s27 = int_to_ptr.vmem [resolvable:$true] %s98_s27 }
  0x15   : > { %s88_s29 = scalar_lea.sflag [#allocation3], %s87_s20  ;;  %s286_s30 = scalar_lea.hbm %s455_s25, 128 }
  0x16   : > { %p287_p2 = scmp.ne.s32.totalorder %s455_s25, %s286_s30  ;;  %p288_p3 = pneg %p459_p13 }
  0x17   : > { %s291_s4 = scalar_lea.hbm %s533_s0, 256  ;;  %p292_p5 = scmp.lt.s32.totalorder %s455_s25, %s533_s0 }
  0x18   : > { %p289_p4 = pnand %p288_p3, %p287_p2  ;;  %p293_p8 = scmp.lt.s32.totalorder %s291_s4, %s286_s30 }
  0x1a   : > { %p290_p7 = pneg %p289_p4  ;;  %p294_p10 = por %p293_p8, %p292_p5 }
  0x1c   : > { %p295_p9 = pnand %p294_p10, %p290_p7 }
  0x1e   : > { %298 = shalt.err (!%p295_p9)
}
  0x1f   : > { %s299_s13 = scalar_lea.vmem %s463_s27, 128  ;;  %s380_s14 = smov [#allocation2]  }
  0x20   : > { %p300_p0 = scmp.ne.s32.totalorder %s463_s27, %s299_s13  ;;  %s304_s16 = sshll.u32 %s380_s14, 4  ;;  %s305_s16 = int_to_ptr.vmem [resolvable:$false] %s304_s16 }
  0x21   : > { %s306_s20 = scalar_lea.vmem %s305_s16, 256  ;;  %p307_p4 = scmp.lt.s32.totalorder %s463_s27, %s305_s16 }
  0x22   : > { %p302_p1 = pnand %p300_p0, %p288_p3  ;;  %p308_p12 = scmp.lt.s32.totalorder %s306_s20, %s299_s13 }
  0x24   : > { %p303_p2 = pneg %p302_p1  ;;  %p309_p11 = por %p308_p12, %p307_p4 }
  0x26   : > { %p310_p6 = pnand %p309_p11, %p303_p2 }
  0x28   : > { %313 = shalt.err (!%p310_p6)
}
  0x29   : > { %245 = dma.hbm_to_vmem [thread:$0]  (!%p459_p13), %s455_s25, 128, %s463_s27, %s88_s29  }
  0x2a   : > { %p542_p9 = scmp.lt.s32.totalorder %s378_s9, 3  ;;  %p543_p7 = scmp.ge.s32.totalorder %s378_s9, 1 }
  0x2c   : > { %p104_p0 = pnand %p543_p7, %p542_p9 }
  0x2d   : > { %s490_s21 = sand.u32 (!%p104_p0), 1, %s370_s7   ;;  %p544_p6 = scmp.ne.s32.totalorder (!%p104_p0), %s538_s17, 0 }
  0x2e   : > { %107 = sbr.rel (%p104_p0) target bundleno = 225 (0xe1), region = 24  ;;  %s232_s22 = sshll.u32 (!%p104_p0), %s490_s21, 3 }
  0x2f   : > { %s110_s23 = scalar_lea.sflag (!%p104_p0), [#allocation3], %s490_s21  ;;  %s113_s24 = scalar_lea.vmem (!%p104_p0), [#allocation2], %s232_s22 }
  0x33   : > { %357 = dma.done.wait (%p544_p6), %s110_s23, 128  }
  0x34   : > { %359 = vsyncadd (%p544_p6), %s110_s23, 4294967168  ;;  %v132_v0 = vld [vmem:[%s113_s24] sm:$0xff]  ;;  %vm134_vm0 = vcmask 261120   ;;  %s235_s25 = sshll.u32 %s413_s10, 7  ;;  %s131_s26 = scalar_lea.vmem [#allocation5], %s232_s22 }
  0x35   : > { %v133_v1 = vmul.f32 %v132_v0, %v132_v0  ;;  %s156_s27 = sshll.u32 %s131_s26, 4  ;;  %s154_s17 = scalar_lea.hbm %s534_s1, %s235_s25  ;;  %s157_s27 = int_to_ptr.vmem [resolvable:$true] %s156_s27 }
  0x36   : > { %s143_s30 = scalar_lea.sflag [#allocation4], %s490_s21  ;;  %s314_s2 = scalar_lea.vmem %s157_s27, 128 }
  0x37   : > { %v135_v2 = vsel %vm134_vm0, %v133_v1, 0.0  ;;  %p315_p11 = scmp.ne.s32.totalorder %s157_s27, %s314_s2  ;;  %p545_p12 = scmp.ne.s32.totalorder %s539_s18, 0 }
  0x38   : > { %136 = vadd.xlane.f32.xlu0 %v135_v2  ;;  %s381_s3 = smov [#allocation5]  }
  0x39   : > { %p316_p13 = pnand %p315_p11, %p545_p12  ;;  %s318_s4 = sshll.u32 %s381_s3, 4  ;;  %s319_s4 = int_to_ptr.vmem [resolvable:$false] %s318_s4 }
  0x3a   : > { %s320_s10 = scalar_lea.vmem %s319_s4, 256  ;;  %p321_p3 = scmp.lt.s32.totalorder %s157_s27, %s319_s4 }
  0x3b   : > { %p317_p1 = pneg %p316_p13  ;;  %p322_p5 = scmp.lt.s32.totalorder %s320_s10, %s314_s2 }
  0x3d   : > { %p323_p8 = por %p322_p5, %p321_p3 }
  0x3f   : > { %p324_p10 = pnand %p323_p8, %p317_p1 }
  0xc1   : > { %v137_v3 = vpop.xlane.xlu0 %136 }
  0xc2   : > { %v138_v4 = vmax.f32 %v137_v3, 1e-12 }
  0xc4   : > { %284 = vrsqrt.f32 %v138_v4 }
  0xd1   : > { %v285_v5 = vpop.eup %284 }
  0xd2   : > { %v140_v6 = vmul.f32 %v285_v5, %v132_v0 }
  0xd4   : > { %141 = vst.msk [vmem:[%s131_s26] sm:$0xff] %vm134_vm0, %v140_v6 }
  0xd5   : > { %327 = shalt.err (!%p324_p10)
}
  0xd6   : > { %s328_s5 = scalar_lea.hbm %s154_s17, 128  ;;  %s332_s14 = scalar_lea.hbm %s534_s1, 256 }
  0xd7   : > { %p329_p2 = scmp.ne.s32.totalorder %s154_s17, %s328_s5  ;;  %p333_p7 = scmp.lt.s32.totalorder %s154_s17, %s534_s1 }
  0xd8   : > { %p334_p0 = scmp.lt.s32.totalorder %s332_s14, %s328_s5 }
  0xd9   : > { %p330_p4 = pnand %p329_p2, %p545_p12 }
  0xda   : > { %p335_p6 = por %p334_p0, %p333_p7 }
  0xdb   : > { %p331_p9 = pneg %p330_p4 }
  0xdd   : > { %p336_p11 = pnand %p335_p6, %p331_p9 }
  0xdf   : > { %339 = shalt.err (!%p336_p11)
}
  0xe0   : > { %240 = dma.vmem_to_hbm [thread:$0]  (%p545_p12), %s157_s27, 128, %s154_s17, %s143_s30  }
  0xe1 PF: > { %s168_s21 = sand.u32 1, %s366_s6   ;;  %p546_p13 = scmp.ne.s32.totalorder %s540_s19, 0 }
  0xe2   : > { %p547_p1 = scmp.ge.s32.totalorder %s378_s9, 2  ;;  %s169_s22 = scalar_lea.sflag [#allocation4], %s168_s21 }
  0xe4   : > { %p247_p3 = pnand %p547_p1, %p546_p13 }
  0xe6   : > { %p248_p5 = pneg %p247_p3 }
  0xe8   : > { %361 = dma.done.wait (%p248_p5), %s169_s22, 128  }
  0xe9   : > { %363 = vsyncadd (%p248_p5), %s169_s22, 4294967168  ;;  %p14_p8 = scmp.ge.s32.totalorder %s417_s12, 4   ;;  %s548_s6 = smov %s370_s7 }
  0xea   : > { %s549_s7 = smov %s374_s8  ;;  %s550_s8 = smov %s429_s15 }
  0xeb   : > { %s551_s9 = smov %s417_s12  ;;  %16 = sbr.rel (!%p14_p8) target bundleno = 5 (0x5), region = 69 }
  0xf0   :  { %174 = vsyncpa [#allocation3], 1 }
  0xf1   :  { %176 = vsyncpa [#allocation3 + $0x1], 1 }
  0xf2   :  { %177 = vsyncpa [#allocation4], 1 }
  0xf3   :  { %179 = vsyncpa [#allocation4 + $0x1], 1 }

</bundles_post_ra>
